<compile_context>
chip_gen: v5e
topology: v5e:2x2
jax: 0.10.0
libtpu: 0.0.40
codegen_flags: <defaults>
</compile_context>

<pallas_src>
import jax
import jax.numpy as jnp
import numpy as np
from jax.experimental import pallas as pl
from jax.experimental.pallas import tpu as pltpu

H1H = 256   # per-branch fc1 width
H1 = 512    # concatenated fc1 width
H2 = 128    # fc2 width


def _round_up(x, m):
    return ((x + m - 1) // m) * m


def critic_kernel(s_ref, a_ref, w1s_ref, w1a_ref, b1s_ref, b1a_ref,
                  w2_ref, b2_ref, w3_ref, b3_ref, o_ref):
    # fc1 (two branches): bf16 MXU operands, f32 accumulation; bias/ReLU in
    # f32; intermediate stored bf16 to halve vreg/VMEM traffic for fc2.
    x1 = jnp.dot(s_ref[...], w1s_ref[...], preferred_element_type=jnp.float32)
    x1 = jnp.maximum(x1 + b1s_ref[...], 0.0).astype(jnp.bfloat16)
    x2 = jnp.dot(a_ref[...], w1a_ref[...], preferred_element_type=jnp.float32)
    x2 = jnp.maximum(x2 + b1a_ref[...], 0.0).astype(jnp.bfloat16)
    x = jnp.concatenate([x1, x2], axis=-1)                  # (tb, 512) bf16

    # fc2 + relu: one K=512 MXU matmul, f32 accumulation.
    h = jnp.dot(x, w2_ref[...], preferred_element_type=jnp.float32)
    h = jnp.maximum(h + b2_ref[...], 0.0)                   # (tb, 128) f32

    # fc3: (tb,128)@(128,1) as VPU multiply + XLU cross-lane reduce,
    # stored lane-dense as a (1, 1, tb) slab.
    q = jnp.sum(h * w3_ref[...], axis=-1) + b3_ref[0, 0]    # (tb,)
    o_ref[...] = q.reshape(o_ref.shape)


def _pick_batch_tile(B, block_b):
    # bf16 LHS packs 16 rows per vreg -> keep tb a multiple of 16.
    # Once the batch supports two >=256-row tiles, keep >=2 grid steps so the
    # "parallel" axis can feed both v7x TensorCores, with tb a multiple of 128
    # and a floor of 256 for the 256-wide MXUs on v6e/v7x.
    if B < 2 * 256:
        return _round_up(max(B, 1), 16)
    tb = min(_round_up(block_b, 128), _round_up(pl.cdiv(B, 2), 128))
    return max(tb, 256)


def critic_forward(state, action, params, *, block_b=512):
    B, state_dim = state.shape
    action_dim = action.shape[1]

    tb = _pick_batch_tile(B, block_b)
    bp = pl.cdiv(B, tb) * tb
    n_tiles = bp // tb

    # bf16 activations from the wrapper: halves B-scaled HBM->VMEM DMA bytes;
    # the MXU consumes bf16 anyway, so numerics are unchanged.
    s = state.astype(jnp.bfloat16)
    a = action.astype(jnp.bfloat16)
    if bp != B:
        s = jnp.pad(s, ((0, bp - B), (0, 0)))
        a = jnp.pad(a, ((0, bp - B), (0, 0)))

    w1s, w1a = params["w1s_bf16"], params["w1a_bf16"]
    b1s, b1a = params["b1s"], params["b1a"]
    w2, b2 = params["w2_bf16"], params["b2"]
    w3, b3 = params["w3_row"], params["b3"]

    weight_bytes = sum(int(np.prod(t.shape)) * t.dtype.itemsize
                       for t in (w1s, w1a, b1s, b1a, w2, b2, w3, b3))
    cost = pl.CostEstimate(
        flops=2 * bp * (state_dim * H1H + action_dim * H1H + H1 * H2 + H2),
        transcendentals=0,
        bytes_accessed=weight_bytes + (s.size + a.size) * 2 + bp * 4,
    )

    out = pl.pallas_call(
        critic_kernel,
        out_shape=jax.ShapeDtypeStruct((n_tiles, 1, tb), jnp.float32),
        grid=(n_tiles,),
        in_specs=[
            pl.BlockSpec((tb, state_dim), lambda i: (i, 0)),    # state tile
            pl.BlockSpec((tb, action_dim), lambda i: (i, 0)),   # action tile
            pl.BlockSpec((state_dim, H1H), lambda i: (0, 0)),   # W1_state
            pl.BlockSpec((action_dim, H1H), lambda i: (0, 0)),  # W1_action
            pl.BlockSpec((1, H1H), lambda i: (0, 0)),           # b1_state
            pl.BlockSpec((1, H1H), lambda i: (0, 0)),           # b1_action
            pl.BlockSpec((H1, H2), lambda i: (0, 0)),           # W2
            pl.BlockSpec((1, H2), lambda i: (0, 0)),            # b2
            pl.BlockSpec((1, H2), lambda i: (0, 0)),            # w3 as a row
            pl.BlockSpec((1, 1), lambda i: (0, 0),
                         memory_space=pltpu.MemorySpace.SMEM),  # b3 scalar
        ],
        out_specs=pl.BlockSpec((1, 1, tb), lambda i: (i, 0, 0)),
        compiler_params=pltpu.CompilerParams(
            dimension_semantics=("parallel",)),
        cost_estimate=cost,
    )(s, a, w1s, w1a, b1s, b1a, w2, b2, w3, b3)

    # (n_tiles, 1, tb) row-major == padded batch order -> (bp, 1), drop pad.
    return out.reshape(bp, 1)[:B]


def xavier_uniform(key, fan_in, fan_out):
    # matches nn.init.xavier_uniform_ on a (fan_out, fan_in) weight; stored
    # transposed as (fan_in, fan_out).
    bound = float(np.sqrt(6.0 / (fan_in + fan_out)))
    return jax.random.uniform(key, (fan_in, fan_out), jnp.float32, -bound, bound)


def linear_bias(key, fan_in, fan_out):
    # PyTorch nn.Linear default bias init: U(-1/sqrt(fan_in), 1/sqrt(fan_in))
    bound = float(1.0 / np.sqrt(fan_in))
    return jax.random.uniform(key, (1, fan_out), jnp.float32, -bound, bound)


def init_params(key, state_dim, action_dim):
    ks = jax.random.split(key, 8)
    w1s = xavier_uniform(ks[0], state_dim, H1H)
    b1s = linear_bias(ks[1], state_dim, H1H)
    w1a = xavier_uniform(ks[2], action_dim, H1H)
    b1a = linear_bias(ks[3], action_dim, H1H)
    w2 = xavier_uniform(ks[4], H1, H2)
    b2 = linear_bias(ks[5], H1, H2)
    w3 = xavier_uniform(ks[6], H2, 1)
    b3 = linear_bias(ks[7], H2, 1)            # (1, 1)

    return {
        # kernel-facing params (bf16 MXU operands; f32 biases for the VPU)
        "w1s_bf16": w1s.astype(jnp.bfloat16),
        "w1a_bf16": w1a.astype(jnp.bfloat16),
        "w2_bf16": w2.astype(jnp.bfloat16),
        "b1s": b1s, "b1a": b1a, "b2": b2,
        "w3_row": w3.T,                        # (1, 128) f32 row for VPU reduce
        "b3": b3,                              # (1, 1) f32, lives in SMEM
        # f32 originals for the reference implementation
        "w1s": w1s, "w1a": w1a, "w2": w2, "w3": w3,
    }


def reference_forward(state, action, p):
    # pure-f32 reference with the original (unfused) PyTorch structure
    x1 = jax.nn.relu(state @ p["w1s"] + p["b1s"])
    x2 = jax.nn.relu(action @ p["w1a"] + p["b1a"])
    x = jnp.concatenate([x1, x2], axis=1)
    h = jax.nn.relu(x @ p["w2"] + p["b2"])
    return h @ p["w3"] + p["b3"]


if __name__ == "__main__":
    B, STATE_DIM, ACTION_DIM = 8, 16, 4

    key = jax.random.PRNGKey(0)
    k_state, k_action, k_params = jax.random.split(key, 3)

    state = jax.random.normal(k_state, (B, STATE_DIM), jnp.float32)
    action = jax.random.normal(k_action, (B, ACTION_DIM), jnp.float32)
    params = init_params(k_params, STATE_DIM, ACTION_DIM)

    out = jax.block_until_ready(critic_forward(state, action, params))

    ref = reference_forward(state, action, params)
    # kernel uses bf16 MXU operands with f32 accumulation -> relaxed tolerance
    np.testing.assert_allclose(np.asarray(out), np.asarray(ref),
                               rtol=5e-2, atol=5e-2)
    assert out.shape == (B, 1)
    print("KERNEL_OK")
</pallas_src>

<mosaic_0001>
module attributes {stable_mosaic.version = 11 : i64} {
  func.func @critic_kernel(%arg0: i32, %arg1: memref<16x16xbf16, #tpu.memory_space<vmem>>, %arg2: memref<16x4xbf16, #tpu.memory_space<vmem>>, %arg3: memref<16x256xbf16, #tpu.memory_space<vmem>>, %arg4: memref<4x256xbf16, #tpu.memory_space<vmem>>, %arg5: memref<1x256xf32, #tpu.memory_space<vmem>>, %arg6: memref<1x256xf32, #tpu.memory_space<vmem>>, %arg7: memref<512x128xbf16, #tpu.memory_space<vmem>>, %arg8: memref<1x128xf32, #tpu.memory_space<vmem>>, %arg9: memref<1x128xf32, #tpu.memory_space<vmem>>, %arg10: memref<1x1xf32, #tpu.memory_space<smem>>, %arg11: memref<1x1x16xf32, #tpu.memory_space<vmem>>) attributes {dimension_semantics = [#tpu.dimension_semantics<parallel>], iteration_bounds = array<i64: 1>, scalar_prefetch = 0 : i64, scratch_operands = 0 : i64, tpu.core_type = #tpu.core_type<tc>, window_params = [{transform_indices = @transform_0, window_bounds = array<i64: 16, 16>}, {transform_indices = @transform_1, window_bounds = array<i64: 16, 4>}, {pipeline_mode = #tpu.pipeline_mode<synchronous>, transform_indices = @transform_2, window_bounds = array<i64: 16, 256>}, {pipeline_mode = #tpu.pipeline_mode<synchronous>, transform_indices = @transform_3, window_bounds = array<i64: 4, 256>}, {pipeline_mode = #tpu.pipeline_mode<synchronous>, transform_indices = @transform_4, window_bounds = array<i64: 1, 256>}, {pipeline_mode = #tpu.pipeline_mode<synchronous>, transform_indices = @transform_5, window_bounds = array<i64: 1, 256>}, {pipeline_mode = #tpu.pipeline_mode<synchronous>, transform_indices = @transform_6, window_bounds = array<i64: 512, 128>}, {pipeline_mode = #tpu.pipeline_mode<synchronous>, transform_indices = @transform_7, window_bounds = array<i64: 1, 128>}, {pipeline_mode = #tpu.pipeline_mode<synchronous>, transform_indices = @transform_8, window_bounds = array<i64: 1, 128>}, {transform_indices = @transform_9, window_bounds = array<i64: 1, 1>}, {transform_indices = @transform_10, window_bounds = array<i64: 1, 1, 16>}]} {
    %c0 = arith.constant 0 : index
    %c0_0 = arith.constant 0 : index
    %0 = vector.load %arg1[%c0, %c0_0] : memref<16x16xbf16, #tpu.memory_space<vmem>>, vector<16x16xbf16>
    %c0_1 = arith.constant 0 : index
    %c0_2 = arith.constant 0 : index
    %1 = vector.load %arg3[%c0_1, %c0_2] : memref<16x256xbf16, #tpu.memory_space<vmem>>, vector<16x256xbf16>
    %cst = arith.constant dense<0.000000e+00> : vector<16x256xf32>
    %2 = tpu.matmul %0, %1, %cst {dimension_numbers = #tpu.dot_dimension_numbers<[1], [0], [0], [1], [0, 0, 1, 1], [], []>} : vector<16x16xbf16>, vector<16x256xbf16>, vector<16x256xf32> -> vector<16x256xf32>
    %c0_3 = arith.constant 0 : index
    %c0_4 = arith.constant 0 : index
    %3 = vector.load %arg5[%c0_3, %c0_4] : memref<1x256xf32, #tpu.memory_space<vmem>>, vector<1x256xf32>
    %4 = vector.broadcast %3 : vector<1x256xf32> to vector<16x256xf32>
    %5 = arith.addf %2, %4 : vector<16x256xf32>
    %cst_5 = arith.constant 0.000000e+00 : f32
    %6 = vector.broadcast %cst_5 : f32 to vector<16x256xf32>
    %7 = arith.maximumf %5, %6 : vector<16x256xf32>
    %8 = arith.truncf %7 : vector<16x256xf32> to vector<16x256xbf16>
    %c0_6 = arith.constant 0 : index
    %c0_7 = arith.constant 0 : index
    %9 = vector.load %arg2[%c0_6, %c0_7] : memref<16x4xbf16, #tpu.memory_space<vmem>>, vector<16x4xbf16>
    %c0_8 = arith.constant 0 : index
    %c0_9 = arith.constant 0 : index
    %10 = vector.load %arg4[%c0_8, %c0_9] : memref<4x256xbf16, #tpu.memory_space<vmem>>, vector<4x256xbf16>
    %cst_10 = arith.constant dense<0.000000e+00> : vector<16x256xf32>
    %11 = tpu.matmul %9, %10, %cst_10 {dimension_numbers = #tpu.dot_dimension_numbers<[1], [0], [0], [1], [0, 0, 1, 1], [], []>} : vector<16x4xbf16>, vector<4x256xbf16>, vector<16x256xf32> -> vector<16x256xf32>
    %c0_11 = arith.constant 0 : index
    %c0_12 = arith.constant 0 : index
    %12 = vector.load %arg6[%c0_11, %c0_12] : memref<1x256xf32, #tpu.memory_space<vmem>>, vector<1x256xf32>
    %13 = vector.broadcast %12 : vector<1x256xf32> to vector<16x256xf32>
    %14 = arith.addf %11, %13 : vector<16x256xf32>
    %cst_13 = arith.constant 0.000000e+00 : f32
    %15 = vector.broadcast %cst_13 : f32 to vector<16x256xf32>
    %16 = arith.maximumf %14, %15 : vector<16x256xf32>
    %17 = arith.truncf %16 : vector<16x256xf32> to vector<16x256xbf16>
    %18 = tpu.concatenate %8, %17 in 1 : vector<16x256xbf16>, vector<16x256xbf16> -> vector<16x512xbf16>
    %c0_14 = arith.constant 0 : index
    %c0_15 = arith.constant 0 : index
    %19 = vector.load %arg7[%c0_14, %c0_15] : memref<512x128xbf16, #tpu.memory_space<vmem>>, vector<512x128xbf16>
    %cst_16 = arith.constant dense<0.000000e+00> : vector<16x128xf32>
    %20 = tpu.matmul %18, %19, %cst_16 {dimension_numbers = #tpu.dot_dimension_numbers<[1], [0], [0], [1], [0, 0, 1, 1], [], []>} : vector<16x512xbf16>, vector<512x128xbf16>, vector<16x128xf32> -> vector<16x128xf32>
    %c0_17 = arith.constant 0 : index
    %c0_18 = arith.constant 0 : index
    %21 = vector.load %arg8[%c0_17, %c0_18] : memref<1x128xf32, #tpu.memory_space<vmem>>, vector<1x128xf32>
    %22 = vector.broadcast %21 : vector<1x128xf32> to vector<16x128xf32>
    %23 = arith.addf %20, %22 : vector<16x128xf32>
    %cst_19 = arith.constant 0.000000e+00 : f32
    %24 = vector.broadcast %cst_19 : f32 to vector<16x128xf32>
    %25 = arith.maximumf %23, %24 : vector<16x128xf32>
    %c0_20 = arith.constant 0 : index
    %c0_21 = arith.constant 0 : index
    %26 = vector.load %arg9[%c0_20, %c0_21] : memref<1x128xf32, #tpu.memory_space<vmem>>, vector<1x128xf32>
    %27 = vector.broadcast %26 : vector<1x128xf32> to vector<16x128xf32>
    %28 = arith.mulf %25, %27 : vector<16x128xf32>
    %cst_22 = arith.constant dense<0.000000e+00> : vector<16xf32>
    %29 = vector.multi_reduction <add>, %28, %cst_22 [1] : vector<16x128xf32> to vector<16xf32>
    %c0_23 = arith.constant 0 : index
    %c0_24 = arith.constant 0 : index
    %30 = memref.load %arg10[%c0_23, %c0_24] : memref<1x1xf32, #tpu.memory_space<smem>>
    %31 = vector.broadcast %30 : f32 to vector<16xf32>
    %32 = arith.addf %29, %31 : vector<16xf32>
    %33 = vector.shape_cast %32 : vector<16xf32> to vector<1x1x16xf32>
    %c0_25 = arith.constant 0 : index
    %c0_26 = arith.constant 0 : index
    %c0_27 = arith.constant 0 : index
    %34 = vector.load %arg11[%c0_25, %c0_26, %c0_27] : memref<1x1x16xf32, #tpu.memory_space<vmem>>, vector<1x1x16xf32>
    tpu.vector_store %arg11[%c0_25, %c0_26, %c0_27], %33 {strides = array<i32>} : memref<1x1x16xf32, #tpu.memory_space<vmem>>, vector<1x1x16xf32>,
    return
  }
  func.func @transform_0(%arg0: i32) -> (i32, i32) {
    %c0_i32 = arith.constant 0 : i32
    %c0_i32_0 = arith.constant 0 : i32
    return %arg0, %c0_i32 : i32, i32
  }
  func.func @transform_1(%arg0: i32) -> (i32, i32) {
    %c0_i32 = arith.constant 0 : i32
    %c0_i32_0 = arith.constant 0 : i32
    return %arg0, %c0_i32 : i32, i32
  }
  func.func @transform_2(%arg0: i32) -> (i32, i32) {
    %c0_i32 = arith.constant 0 : i32
    %c0_i32_0 = arith.constant 0 : i32
    %c0_i32_1 = arith.constant 0 : i32
    return %c0_i32, %c0_i32_0 : i32, i32
  }
  func.func @transform_3(%arg0: i32) -> (i32, i32) {
    %c0_i32 = arith.constant 0 : i32
    %c0_i32_0 = arith.constant 0 : i32
    %c0_i32_1 = arith.constant 0 : i32
    return %c0_i32, %c0_i32_0 : i32, i32
  }
  func.func @transform_4(%arg0: i32) -> (i32, i32) {
    %c0_i32 = arith.constant 0 : i32
    %c0_i32_0 = arith.constant 0 : i32
    %c0_i32_1 = arith.constant 0 : i32
    return %c0_i32, %c0_i32_0 : i32, i32
  }
  func.func @transform_5(%arg0: i32) -> (i32, i32) {
    %c0_i32 = arith.constant 0 : i32
    %c0_i32_0 = arith.constant 0 : i32
    %c0_i32_1 = arith.constant 0 : i32
    return %c0_i32, %c0_i32_0 : i32, i32
  }
  func.func @transform_6(%arg0: i32) -> (i32, i32) {
    %c0_i32 = arith.constant 0 : i32
    %c0_i32_0 = arith.constant 0 : i32
    %c0_i32_1 = arith.constant 0 : i32
    return %c0_i32, %c0_i32_0 : i32, i32
  }
  func.func @transform_7(%arg0: i32) -> (i32, i32) {
    %c0_i32 = arith.constant 0 : i32
    %c0_i32_0 = arith.constant 0 : i32
    %c0_i32_1 = arith.constant 0 : i32
    return %c0_i32, %c0_i32_0 : i32, i32
  }
  func.func @transform_8(%arg0: i32) -> (i32, i32) {
    %c0_i32 = arith.constant 0 : i32
    %c0_i32_0 = arith.constant 0 : i32
    %c0_i32_1 = arith.constant 0 : i32
    return %c0_i32, %c0_i32_0 : i32, i32
  }
  func.func @transform_9(%arg0: i32) -> (i32, i32) {
    %c0_i32 = arith.constant 0 : i32
    %c0_i32_0 = arith.constant 0 : i32
    %c0_i32_1 = arith.constant 0 : i32
    return %c0_i32, %c0_i32_0 : i32, i32
  }
  func.func @transform_10(%arg0: i32) -> (i32, i32, i32) {
    %c0_i32 = arith.constant 0 : i32
    %c0_i32_0 = arith.constant 0 : i32
    %c0_i32_1 = arith.constant 0 : i32
    return %arg0, %c0_i32, %c0_i32_0 : i32, i32, i32
  }
}

</mosaic_0001>

<bundles_post_ra>
// kernel: tpu_custom_call.1
= control target key start
LH: loop header
LB: loop body
LE: loop exit
PB: predicated region body
PF: predicated region fallthrough
CT: control target
= control target key end

     0   :  { %16 = vsyncpa [#allocation4], 0  ;;  %s942_s0 = inlined_call_operand.vmem [shape: bf16[16,16], index: 0, kind: input, shape index: {}]   ;;  %s943_s1 = inlined_call_operand.vmem [shape: bf16[16,4], index: 1, kind: input, shape index: {}]   ;;  %s944_s2 = inlined_call_operand.hbm [shape: bf16[16,256], index: 2, kind: input, shape index: {}]   ;;  %s945_s3 = inlined_call_operand.vmem [shape: bf16[4,256], index: 3, kind: input, shape index: {}]   ;;  %s946_s4 = inlined_call_operand.vmem [shape: f32[1,256], index: 4, kind: input, shape index: {}]   ;;  %s947_s5 = inlined_call_operand.vmem [shape: f32[1,256], index: 5, kind: input, shape index: {}]   ;;  %s948_s6 = inlined_call_operand.hbm [shape: bf16[512,128], index: 6, kind: input, shape index: {}]   ;;  %s949_s7 = inlined_call_operand.vmem [shape: f32[1,128], index: 7, kind: input, shape index: {}]   ;;  %s950_s8 = inlined_call_operand.vmem [shape: f32[1,128], index: 8, kind: input, shape index: {}]   ;;  %s951_s9 = inlined_call_operand.<no memory space> [shape: f32[1,1], index: 9, kind: input, shape index: {}]   ;;  %s952_s10 = inlined_call_operand.hbm [shape: f32[1,1,16], index: 10, kind: output, shape index: {}]  }
   0x1   :  { %17 = vsyncpa [#allocation7], 0 }
   0x2   :  { %18 = vsyncpa [#allocation5], 0  ;;  %s27_s15 = sshll.u32 %s944_s2, 4  ;;  %s847_s16 = smov [#allocation3]   ;;  %s28_s15 = int_to_ptr.hbm [resolvable:$true] %s27_s15 }
   0x3   :  { %s29_s17 = sshll.u32 %s847_s16, 4  ;;  %s46_s20 = sshll.u32 %s948_s6, 4  ;;  %s30_s17 = int_to_ptr.vmem [resolvable:$true] %s29_s17  ;;  %s47_s20 = int_to_ptr.hbm [resolvable:$true] %s46_s20 }
   0x4   :  { %s848_s21 = smov 128   ;;  %s849_s22 = smov 8  }
   0x5   :  { %35 = dma.hbm_to_vmem [thread:$0]  %s28_s15, 256, %s30_s17, [#allocation4], %s848_s21, %s848_s21, %s849_s22  }
   0x6   :  { %s850_s23 = smov [#allocation6]   ;;  %s851_s25 = smov 64  }
   0x7   :  { %s48_s24 = sshll.u32 %s850_s23, 4  ;;  %s852_s26 = smov 4   ;;  %s49_s24 = int_to_ptr.vmem [resolvable:$true] %s48_s24 }
   0x8   :  { %54 = dma.hbm_to_vmem [thread:$0]  %s47_s20, 4096, %s49_s24, [#allocation7], %s851_s25, %s851_s25, %s852_s26  }
   0x9   :  { %841 = dma.done.wait [#allocation4], 256  }
   0xa   :  { %842 = vsyncadd [#allocation4], 4294967040 }
   0xb   :  { %843 = dma.done.wait [#allocation7], 4096  }
   0xc   :  { %844 = vsyncadd [#allocation7], 4294963200  ;;  %v582_v0 = vld [vmem:[#allocation3] sm:$0xf]  ;;  %v726_v1 = vld [vmem:[#allocation3 + $0x4] sm:$0xf0] }
   0xd   :  { %v725_v2 = vld [vmem:[#allocation3 + $0x4] sm:$0xf]  ;;  %v583_v3 = vor.u32 %v726_v1, %v582_v0  ;;  %v584_v4 = vld [vmem:[#allocation3 + $0x8] sm:$0xf0]  ;;  %v135_v5 = vld [vmem:[%s945_s3] sm:$0xf] }
   0xe   :  { %v587_v6 = vor.u32 %v725_v2, %v584_v4  ;;  %v724_v7 = vld [vmem:[%s942_s0] sm:$0xff]  ;;  %148 = vst [vmem:[#allocation1] ss:$4 sm:$0xff] %v135_v5  ;;  %v735_v8 = vld [vmem:[#allocation6 + $0x38] sm:$0xff]  ;;  %vm95_vm0 = vcmask 130048   ;;  %v734_v10 = vld [vmem:[#allocation6 + $0x30] sm:$0xff] }
   0xf   :  { %v743_v9 = vld [vmem:[#allocation6 + $0x78] sm:$0xff]  ;;  %106 = vmatpush.bf16.msra.mxu0 %v583_v3  ;;  %v742_v11 = vld [vmem:[#allocation6 + $0x70] sm:$0xff]  ;;  %vm155_vm1 = vcmask 1041408   ;;  %v733_v12 = vld [vmem:[#allocation6 + $0x28] sm:$0xff]  ;;  %vm151_vm2 = vcmask 31744   ;;  %s565_s18 = sshll.u32 %s952_s10, 4  ;;  %s566_s18 = int_to_ptr.hbm [resolvable:$true] %s565_s18 }
  0x10   :  { %120 = vmatpush.bf16.msra.mxu1 %v587_v6  ;;  %v741_v13 = vld [vmem:[#allocation6 + $0x68] sm:$0xff]  ;;  %v732_v19 = vld [vmem:[#allocation6 + $0x20] sm:$0xff]  ;;  %v751_v21 = vld [vmem:[#allocation6 + $0xb8] sm:$0xff]  ;;  %vm553_vm3 = vcmask 130112   ;;  %vm556_vm4 = vcmask 122880  }
  0x11   :  { %v727_v18 = vld [vmem:[%s943_s1] sm:$0xff]  ;;  %v740_v20 = vld [vmem:[#allocation6 + $0x60] sm:$0xff]  ;;  %v759_v22 = vld [vmem:[#allocation6 + $0xf8] sm:$0xff] }
  0x12   :  { %588 = vmatmul.msk.bf16.vlgmr.msra.gmra.mxu0 %vm95_vm0, %v724_v7  ;;  %v731_v23 = vld [vmem:[#allocation6 + $0x18] sm:$0xff]  ;;  %v750_v25 = vld [vmem:[#allocation6 + $0xb0] sm:$0xff]  ;;  %v749_v29 = vld [vmem:[#allocation6 + $0xa8] sm:$0xff] }
  0x13   :  { %474 = vmatpush.bf16.msrb.mxu0 %v735_v8  ;;  %589 = vmatmul.msk.bf16.vlgmr.msra.gmra.mxu1 %vm95_vm0, %v724_v7  ;;  %v739_v24 = vld [vmem:[#allocation6 + $0x58] sm:$0xff]  ;;  %v758_v26 = vld [vmem:[#allocation6 + $0xf0] sm:$0xff]  ;;  %v757_v30 = vld [vmem:[#allocation6 + $0xe8] sm:$0xff] }
  0x14   :  { %488 = vmatpush.bf16.msrb.mxu1 %v743_v9  ;;  %v730_v27 = vld [vmem:[#allocation6 + $0x10] sm:$0xff]  ;;  %v729_v31 = vld [vmem:[#allocation6 + $0x8] sm:$0xff]  ;;  %v748_v33 = vld [vmem:[#allocation6 + $0xa0] sm:$0xff] }
  0x15   :  { %v149_v14 = vld.sshfl [vmem:[#allocation1] sm:$0xff pattern:$0x73625140]  ;;  %v150_v15 = vld.sshfl [vmem:[#allocation1 + $0x8] sm:$0xff pattern:$0x73625140] }
  0x16   :  { %v156_v16 = vsel %vm155_vm1, %v149_v14, 0  ;;  %v158_v17 = vsel %vm155_vm1, %v150_v15, 0  ;;  %v738_v28 = vld [vmem:[#allocation6 + $0x50] sm:$0xff]  ;;  %v737_v32 = vld [vmem:[#allocation6 + $0x48] sm:$0xff]  ;;  %v756_v34 = vld [vmem:[#allocation6 + $0xe0] sm:$0xff] }
  0x17   :  { %475 = vmatpush.bf16.msrb.mxu0 %v734_v10  ;;  %167 = vmatpush.bf16.msra.mxu2 %v156_v16  ;;  %v728_v35 = vld [vmem:[#allocation6] sm:$0xff]  ;;  %v747_v37 = vld [vmem:[#allocation6 + $0x98] sm:$0xff]  ;;  %v746_v39 = vld [vmem:[#allocation6 + $0x90] sm:$0xff] }
  0x18   :  { %489 = vmatpush.bf16.msrb.mxu1 %v742_v11  ;;  %181 = vmatpush.bf16.msra.mxu3 %v158_v17  ;;  %v736_v36 = vld [vmem:[#allocation6 + $0x40] sm:$0xff]  ;;  %v755_v38 = vld [vmem:[#allocation6 + $0xd8] sm:$0xff]  ;;  %v754_v40 = vld [vmem:[#allocation6 + $0xd0] sm:$0xff] }
  0x19   :  { %v745_v41 = vld [vmem:[#allocation6 + $0x88] sm:$0xff]  ;;  %v744_v44 = vld [vmem:[#allocation6 + $0x80] sm:$0xff] }
  0x1a   :  { %594 = vmatmul.msk.bf16.vlgmr.msra.gmra.mxu2 %vm151_vm2, %v727_v18  ;;  %v753_v42 = vld [vmem:[#allocation6 + $0xc8] sm:$0xff]  ;;  %v752_v45 = vld [vmem:[#allocation6 + $0xc0] sm:$0xff] }
  0x1b   :  { %476 = vmatpush.bf16.msrb.mxu0 %v733_v12  ;;  %595 = vmatmul.msk.bf16.vlgmr.msra.gmra.mxu3 %vm151_vm2, %v727_v18  ;;  %v74_v43 = vld [vmem:[%s946_s4] sm:$0x3] }
  0x1c   :  { %490 = vmatpush.bf16.msrb.mxu1 %v741_v13  ;;  %502 = vmatpush.bf16.msrb.mxu2 %v751_v21  ;;  %v76_v46 = vperm.slane %v74_v43, 0  ;;  %v77_v47 = vperm.slane %v74_v43, 1  ;;  %v136_v59 = vld [vmem:[%s947_s5] sm:$0x3] }
  0x1d   :  { %516 = vmatpush.bf16.msrb.mxu3 %v759_v22  ;;  %v138_v62 = vperm.slane %v136_v59, 0  ;;  %v139_v63 = vperm.slane %v136_v59, 1 }
  0x1f   :  { %477 = vmatpush.bf16.msrb.mxu0 %v732_v19 }
  0x20   :  { %491 = vmatpush.bf16.msrb.mxu1 %v740_v20  ;;  %503 = vmatpush.bf16.msrb.mxu2 %v750_v25 }
  0x21   :  { %517 = vmatpush.bf16.msrb.mxu3 %v758_v26 }
  0x23   :  { %478 = vmatpush.bf16.msrb.mxu0 %v731_v23 }
  0x24   :  { %492 = vmatpush.bf16.msrb.mxu1 %v739_v24  ;;  %504 = vmatpush.bf16.msrb.mxu2 %v749_v29 }
  0x25   :  { %518 = vmatpush.bf16.msrb.mxu3 %v757_v30 }
  0x27   :  { %479 = vmatpush.bf16.msrb.mxu0 %v730_v27 }
  0x28   :  { %493 = vmatpush.bf16.msrb.mxu1 %v738_v28  ;;  %505 = vmatpush.bf16.msrb.mxu2 %v748_v33  ;;  %v767_v28 = vld [vmem:[%s949_s7] ss:$0 sm:$0xff] }
  0x29   :  { %519 = vmatpush.bf16.msrb.mxu3 %v756_v34 }
  0x2b   :  { %480 = vmatpush.bf16.msrb.mxu0 %v729_v31 }
  0x2c   :  { %494 = vmatpush.bf16.msrb.mxu1 %v737_v32  ;;  %506 = vmatpush.bf16.msrb.mxu2 %v747_v37 }
  0x2d   :  { %520 = vmatpush.bf16.msrb.mxu3 %v755_v38  ;;  %v768_v38 = vld [vmem:[%s950_s8] ss:$0 sm:$0xff]  ;;  %s853_s8 = smov [#allocation8]  }
  0x2e   :  { %s563_s15 = sshll.u32 %s853_s8, 4  ;;  %s564_s15 = int_to_ptr.vmem [resolvable:$true] %s563_s15 }
  0x2f   :  { %481 = vmatpush.bf16.msrb.mxu0 %v728_v35 }
  0x30   :  { %495 = vmatpush.bf16.msrb.mxu1 %v736_v36  ;;  %507 = vmatpush.bf16.msrb.mxu2 %v746_v39 }
  0x31   :  { %521 = vmatpush.bf16.msrb.mxu3 %v754_v40 }
  0x34   :  { %508 = vmatpush.bf16.msrb.mxu2 %v745_v41 }
  0x35   :  { %522 = vmatpush.bf16.msrb.mxu3 %v753_v42 }
  0x38   :  { %509 = vmatpush.bf16.msrb.mxu2 %v744_v44 }
  0x39   :  { %523 = vmatpush.bf16.msrb.mxu3 %v752_v45 }
  0x8f   :  { %v108_v48 = vpop.f32.mrf.mxu0 }
  0x90   :  { %v122_v49 = vpop.f32.mrf.mxu1  ;;  %v109_v50 = vadd.f32 %v108_v48, %v76_v46 }
  0x91   :  { %v123_v51 = vadd.f32 %v122_v49, %v77_v47 }
  0x92   :  { %v127_v52 = vmax.f32 %v109_v50, 0.0  ;;  %v548_v50 = vlaneseq }
  0x93   :  { %v128_v53 = vmax.f32 %v123_v51, 0.0  ;;  %v543_v51 = vstv %s951_s9 }
  0x95   :  { %v131_v57 = vpack.c.bf16 %v128_v53, %v127_v52  ;;  %v549_v52 = vand.u32 127, %v548_v50 }
  0x97   :  { %v110_v54 = vpop.f32.mrf.mxu0  ;;  %v196_v0 = vunpack.c.l.b16 %v131_v57  ;;  %v197_v1 = vunpack.c.h.b16 %v131_v57 }
  0x98   :  { %v111_v55 = vadd.f32 %v110_v54, %v76_v46  ;;  %v124_v56 = vpop.f32.mrf.mxu1  ;;  %v551_v54 = vadd.s32 4294967288, %v549_v52 }
  0x99   :  { %v125_v58 = vadd.f32 %v124_v56, %v77_v47 }
  0x9a   :  { %v129_v60 = vmax.f32 %v111_v55, 0.0 }
  0x9b   :  { %v130_v61 = vmax.f32 %v125_v58, 0.0 }
  0x9d   :  { %v132_v2 = vpack.c.bf16 %v130_v61, %v129_v60  ;;  %v169_v3 = vpop.f32.mrf.mxu2 }
  0x9e   :  { %v183_v4 = vpop.f32.mrf.mxu3  ;;  %v170_v7 = vadd.f32 %v169_v3, %v138_v62 }
  0x9f   :  { %v198_v5 = vunpack.c.l.b16 %v132_v2  ;;  %v199_v6 = vunpack.c.h.b16 %v132_v2  ;;  %v184_v8 = vadd.f32 %v183_v4, %v139_v63 }
  0xa0   :  { %v188_v11 = vmax.f32 %v170_v7, 0.0 }
  0xa1   :  { %v200_v9 = vpack.c.b16 %v198_v5, %v196_v0  ;;  %v201_v10 = vpack.c.b16 %v199_v6, %v197_v1  ;;  %v189_v12 = vmax.f32 %v184_v8, 0.0 }
  0xa3   :  { %482 = vmatmul.bf16.vlgmr.msrb.gmra.mxu0 %v200_v9  ;;  %496 = vmatmul.bf16.vlgmr.msrb.gmra.mxu1 %v201_v10  ;;  %v192_v17 = vpack.c.bf16 %v189_v12, %v188_v11 }
  0xa5   :  { %v171_v13 = vpop.f32.mrf.mxu2  ;;  %v206_v21 = vunpack.c.l.b16 %v192_v17  ;;  %v207_v22 = vunpack.c.h.b16 %v192_v17 }
  0xa6   :  { %v185_v14 = vpop.f32.mrf.mxu3  ;;  %v172_v15 = vadd.f32 %v171_v13, %v138_v62 }
  0xa7   :  { %v186_v16 = vadd.f32 %v185_v14, %v139_v63 }
  0xa8   :  { %v190_v18 = vmax.f32 %v172_v15, 0.0 }
  0xa9   :  { %v191_v19 = vmax.f32 %v186_v16, 0.0 }
  0xab   :  { %v193_v20 = vpack.c.bf16 %v191_v19, %v190_v18 }
  0xad   :  { %v208_v23 = vunpack.c.l.b16 %v193_v20  ;;  %v209_v24 = vunpack.c.h.b16 %v193_v20 }
  0xaf   :  { %v210_v25 = vpack.c.b16 %v208_v23, %v206_v21  ;;  %v211_v26 = vpack.c.b16 %v209_v24, %v207_v22 }
  0xb1   :  { %510 = vmatmul.bf16.vlgmr.msrb.gmra.mxu2 %v210_v25  ;;  %524 = vmatmul.bf16.vlgmr.msrb.gmra.mxu3 %v211_v26 }
 0x120   :  { %v483_v27 = vpop.f32.mrf.mxu0  ;;  %v497_v30 = vpop.f32.mrf.mxu1 }
 0x121   :  { %v484_v29 = vadd.f32 %v767_v28, %v483_v27 }
 0x123   :  { %v498_v31 = vadd.f32 %v497_v30, %v484_v29 }
 0x128   :  { %v485_v32 = vpop.f32.mrf.mxu0  ;;  %v499_v40 = vpop.f32.mrf.mxu1 }
 0x129   :  { %v486_v36 = vadd.f32 %v767_v28, %v485_v32 }
 0x12b   :  { %v500_v41 = vadd.f32 %v499_v40, %v486_v36 }
 0x134   :  { %v511_v33 = vpop.f32.mrf.mxu2  ;;  %v525_v34 = vpop.f32.mrf.mxu3 }
 0x135   :  { %v512_v35 = vadd.f32 %v511_v33, %v498_v31 }
 0x137   :  { %v526_v37 = vadd.f32 %v525_v34, %v512_v35 }
 0x139   :  { %v530_v39 = vmax.f32 %v526_v37, 0.0 }
 0x13b   :  { %v536_v42 = vmul.f32 %v768_v38, %v530_v39 }
 0x13c   :  { %v513_v43 = vpop.f32.mrf.mxu2  ;;  %v527_v45 = vpop.f32.mrf.mxu3 }
 0x13d   :  { %v514_v44 = vadd.f32 %v513_v43, %v500_v41  ;;  %538 = vadd.xlane.f32.xlu0 %v536_v42 }
 0x13f   :  { %v528_v46 = vadd.f32 %v527_v45, %v514_v44 }
 0x141   :  { %v531_v47 = vmax.f32 %v528_v46, 0.0 }
 0x143   :  { %v537_v48 = vmul.f32 %v768_v38, %v531_v47 }
 0x145   :  { %540 = vadd.xlane.f32.xlu0 %v537_v48 }
 0x1b0   :  { %v539_v49 = vpop.xlane.xlu0 %538 }
 0x1b1   :  { %v544_v53 = vadd.f32 %v543_v51, %v539_v49 }
 0x1b3   :  { %v550_v57 = vperm.slane %v544_v53, %v549_v52 }
 0x1b8   :  { %v541_v55 = vpop.xlane.xlu0 %540 }
 0x1b9   :  { %v545_v56 = vadd.f32 %v543_v51, %v541_v55 }
 0x1bb   :  { %v552_v58 = vperm.slane %v545_v56, %v551_v54 }
 0x1bd   :  { %v554_v59 = vsel %vm553_vm3, %v552_v58, %v550_v57 }
 0x1be   :  { %557 = vst.msk [vmem:[#allocation8] sm:$0x1] %vm556_vm4, %v554_v59 }
 0x1bf   :  { %568 = dma.vmem_to_hbm [thread:$0]  %s564_s15, 16, %s566_s18, [#allocation5]  }
 0x1c0   :  { %845 = dma.done.wait [#allocation5], 16  }
 0x1c1   :  { %846 = vsyncadd [#allocation5], 4294967280 }
 0x1c2   :  { %573 = vsyncpa [#allocation4], 1 }
 0x1c3   :  { %574 = vsyncpa [#allocation7], 1 }
 0x1c4   :  { %575 = vsyncpa [#allocation5], 1 }

</bundles_post_ra>
